<compile_context>
chip_gen: v7x
topology: tpu7x:2x2x1
jax: 0.10.0
libtpu: 0.0.40
codegen_flags: <defaults>
</compile_context>

<pallas_src>
import functools

import jax
import jax.numpy as jnp
from jax import lax
from jax.experimental import pallas as pl
from jax.experimental.pallas import tpu as pltpu


def _drl_kernel(x_ref, xh_ref, w3_ref, bd_ref, w1_ref, b1_ref, o_ref, carry_ref,
                *, T, tT, d, compute_dtype):
    """One (batch, time-tile) grid step.

    x_ref  : (1, C, tT)    current time tile (time on lanes)
    xh_ref : (1, C, H)     right-halo window = start of the next tile
    w3_ref : (Cout, 3*C)   fused dilated-conv weights [tap -d | tap 0 | tap +d]
    bd_ref : (Cout, 1)     dilated-conv bias
    w1_ref : (Cout, Cout)  1x1-conv weights
    b1_ref : (Cout, 1)     1x1-conv bias
    o_ref  : (1, Cout, tT)
    carry_ref : (C, d)     last d columns of the previous tile (left halo)
    """
    t = pl.program_id(1)

    xm = x_ref[0]                                                # (C, tT)
    if T % tT != 0:
        # Last tile is ragged: zero out-of-range columns so they cannot leak
        # into valid outputs through the +d tap.
        col = lax.broadcasted_iota(jnp.int32, (1, tT), 1)
        xm = jnp.where(col < (T - t * tT), xm, 0.0)

    # Left halo: last d columns of the previous tile (zeros at sequence start).
    left = jnp.where(t > 0, carry_ref[...], 0.0)                 # (C, d)
    # Right halo: first d columns of the next tile (zeros past sequence end).
    col_h = lax.broadcasted_iota(jnp.int32, (1, d), 1)
    right = jnp.where(col_h < (T - (t + 1) * tT), xh_ref[0, :, :d], 0.0)
    # Update the carry for the next tile of this batch row (the time grid axis
    # is "arbitrary" == sequential, so this ordering is guaranteed).
    carry_ref[...] = xm[:, tT - d:]

    cd = compute_dtype
    xc = xm.astype(cd)
    tap_m = jnp.concatenate([left.astype(cd), xc[:, :tT - d]], axis=1)   # x[t-d]
    tap_p = jnp.concatenate([xc[:, d:], right.astype(cd)], axis=1)       # x[t+d]
    rhs = jnp.concatenate([tap_m, xc, tap_p], axis=0)                    # (3C, tT)

    # Fused dilated conv: one MXU pass, K = 3*Cin, N = tT (lane-dense output).
    hid = jnp.dot(w3_ref[...], rhs, preferred_element_type=jnp.float32)
    hid = jnp.maximum(hid + bd_ref[...], 0.0)                    # bias + ReLU
    y = jnp.dot(w1_ref[...], hid.astype(cd), preferred_element_type=jnp.float32)
    y = y + b1_ref[...]
    # TODO(synk): dropout is identity here (inference mode); training-mode
    # dropout would need pltpu.prng_seed / pltpu.prng_random_bits masking.
    o_ref[0] = (xm + y).astype(o_ref.dtype)


def _choose_time_tiling(T, d, time_tile):
    """Pick (tT, H): time-tile width (multiple of 128) and right-halo width
    (multiple of 128, >= d, dividing tT). Short sequences use one full tile."""
    H = max(128, ((d + 127) // 128) * 128)
    tT = max(int(time_tile), 2 * H)
    tT = ((tT + H - 1) // H) * H
    if T <= tT:
        return T, T
    return tT, H


def dilated_residual_layer(x_nct, w_d, b_d, w_1x1, b_1x1, *, dilation,
                           compute_dtype=jnp.bfloat16, time_tile=2048):
    """Forward pass of DilatedResidualLayer (non-causal, kernel_size=3).

    x_nct : (N, C, T) activations, PyTorch Conv1d layout (kept as-is).
    w_d   : (Cout, Cin, 3), b_d: (Cout,)   -- dilated conv
    w_1x1 : (Cout, Cout, 1), b_1x1: (Cout,) -- pointwise conv
    compute_dtype: dtype fed to the MXU (bf16 on v6e/v7x; accumulation is f32).
    Returns (N, Cout, T).
    """
    N, C, T = x_nct.shape
    Cout, Cin, K = w_d.shape
    assert K == 3 and Cin == C, "expected kernel_size=3 and in_channels == C"
    assert Cout == C, "residual add requires out_channels == in_channels"
    d = int(dilation)
    assert 0 < d < T, "dilation must be in (0, T)"

    tT, H = _choose_time_tiling(T, d, time_tile)
    nt = pl.cdiv(T, tT)
    q = tT // H                       # halo blocks per time tile
    h_last = pl.cdiv(T, H) - 1        # last valid halo-block index

    # Fuse the 3 taps along K: W3[co, k*Cin + ci] = w_d[co, ci, k].
    w3 = jnp.transpose(w_d, (0, 2, 1)).reshape(Cout, 3 * Cin).astype(compute_dtype)
    w1 = w_1x1[:, :, 0].astype(compute_dtype)
    bd = b_d.reshape(Cout, 1).astype(jnp.float32)
    b1 = b_1x1.reshape(Cout, 1).astype(jnp.float32)

    kernel = functools.partial(_drl_kernel, T=T, tT=tT, d=d,
                               compute_dtype=compute_dtype)

    itemsize = x_nct.dtype.itemsize
    cost = pl.CostEstimate(
        flops=2 * N * T * Cout * (3 * Cin + Cout),
        transcendentals=0,
        bytes_accessed=int(2 * N * C * T * itemsize
                           + w3.size * w3.dtype.itemsize
                           + w1.size * w1.dtype.itemsize))

    return pl.pallas_call(
        kernel,
        out_shape=jax.ShapeDtypeStruct((N, Cout, T), x_nct.dtype),
        grid_spec=pltpu.PrefetchScalarGridSpec(
            num_scalar_prefetch=0,
            grid=(N, nt),
            in_specs=[
                # current time tile
                pl.BlockSpec((1, C, tT), lambda n, t: (n, 0, t)),
                # thin right-halo window (start of the next tile, clamped)
                pl.BlockSpec((1, C, H),
                             lambda n, t: (n, 0, jnp.minimum((t + 1) * q, h_last))),
                pl.BlockSpec((Cout, 3 * Cin), lambda n, t: (0, 0)),
                pl.BlockSpec((Cout, 1), lambda n, t: (0, 0)),
                pl.BlockSpec((Cout, Cout), lambda n, t: (0, 0)),
                pl.BlockSpec((Cout, 1), lambda n, t: (0, 0)),
            ],
            out_specs=pl.BlockSpec((1, Cout, tT), lambda n, t: (n, 0, t)),
            scratch_shapes=[pltpu.VMEM((C, d), x_nct.dtype)],
        ),
        compiler_params=pltpu.CompilerParams(
            dimension_semantics=("parallel", "arbitrary")),
        cost_estimate=cost,
    )(x_nct, x_nct, w3, bd, w1, b1)


def _reference(x_nct, w_d, b_d, w_1x1, b_1x1, dilation):
    """Pure-JAX reference (matches PyTorch Conv1d, eval-mode dropout)."""
    d = int(dilation)
    N, C, T = x_nct.shape
    x = jnp.transpose(x_nct, (0, 2, 1))                       # (N, T, C)
    xp = jnp.pad(x, ((0, 0), (d, d), (0, 0)))
    out = b_d.reshape(1, 1, -1)
    for k in range(3):
        out = out + jnp.einsum("ntc,co->nto", xp[:, k * d:k * d + T, :],
                               w_d[:, :, k].T, precision="highest")
    out = jnp.maximum(out, 0.0)
    out = jnp.einsum("ntc,co->nto", out, w_1x1[:, :, 0].T,
                     precision="highest") + b_1x1.reshape(1, 1, -1)
    return x_nct + jnp.transpose(out, (0, 2, 1))


def _make_params(key, C):
    k_wd, k_bd, k_w1, k_b1 = jax.random.split(key, 4)
    w_d = 0.3 * jax.random.normal(k_wd, (C, C, 3), dtype=jnp.float32)
    b_d = 0.1 * jax.random.normal(k_bd, (C,), dtype=jnp.float32)
    w_1x1 = 0.3 * jax.random.normal(k_w1, (C, C, 1), dtype=jnp.float32)
    b_1x1 = 0.1 * jax.random.normal(k_b1, (C,), dtype=jnp.float32)
    return w_d, b_d, w_1x1, b_1x1


if __name__ == "__main__":
    key = jax.random.PRNGKey(0)

    # --- Test 1: small shapes (single-tile path), f32 MXU operands.
    N, C, T, d = 2, 4, 16, 2
    k_x, k_p, key = jax.random.split(key, 3)
    x = jax.random.normal(k_x, (N, C, T), dtype=jnp.float32)
    w_d, b_d, w_1x1, b_1x1 = _make_params(k_p, C)
    out = dilated_residual_layer(x, w_d, b_d, w_1x1, b_1x1, dilation=d,
                                 compute_dtype=jnp.float32)
    out = jax.block_until_ready(out)
    ref = _reference(x, w_d, b_d, w_1x1, b_1x1, d)
    assert out.shape == (N, C, T)
    assert jnp.allclose(out, ref, atol=3e-2, rtol=3e-2), "f32 single-tile mismatch"

    # --- Test 2: same shapes, bf16 MXU operands (v6e/v7x fast path).
    out_bf = dilated_residual_layer(x, w_d, b_d, w_1x1, b_1x1, dilation=d,
                                    compute_dtype=jnp.bfloat16)
    out_bf = jax.block_until_ready(out_bf)
    assert jnp.allclose(out_bf, ref, atol=6e-2, rtol=6e-2), "bf16 mismatch"

    # --- Test 3: multi-tile path (halo carry + right-halo stream + ragged
    #             last tile), still small: T=384 with 256-wide tiles.
    N, C, T, d = 2, 8, 384, 64
    k_x, k_p, key = jax.random.split(key, 3)
    x = jax.random.normal(k_x, (N, C, T), dtype=jnp.float32)
    w_d, b_d, w_1x1, b_1x1 = _make_params(k_p, C)
    out = dilated_residual_layer(x, w_d, b_d, w_1x1, b_1x1, dilation=d,
                                 compute_dtype=jnp.float32, time_tile=128)
    out = jax.block_until_ready(out)
    ref = _reference(x, w_d, b_d, w_1x1, b_1x1, d)
    assert out.shape == (N, C, T)
    assert jnp.allclose(out, ref, atol=3e-2, rtol=3e-2), "tiled-path mismatch"

    print("KERNEL_OK")
</pallas_src>

<mosaic_0001>
module attributes {stable_mosaic.version = 11 : i64} {
  func.func @_drl_kernel(%arg0: i32, %arg1: i32, %arg2: memref<1x4x16xf32, #tpu.memory_space<vmem>>, %arg3: memref<1x4x16xf32, #tpu.memory_space<vmem>>, %arg4: memref<4x12xf32, #tpu.memory_space<vmem>>, %arg5: memref<4x1xf32, #tpu.memory_space<vmem>>, %arg6: memref<4x4xf32, #tpu.memory_space<vmem>>, %arg7: memref<4x1xf32, #tpu.memory_space<vmem>>, %arg8: memref<1x4x16xf32, #tpu.memory_space<vmem>>, %arg9: memref<4x2xf32, #tpu.memory_space<vmem>>) attributes {dimension_semantics = [#tpu.dimension_semantics<parallel>, #tpu.dimension_semantics<arbitrary>], iteration_bounds = array<i64: 2, 1>, scalar_prefetch = 0 : i64, scratch_operands = 1 : i64, tpu.core_type = #tpu.core_type<tc>, window_params = [{transform_indices = @transform_0, window_bounds = array<i64: 1, 4, 16>}, {transform_indices = @transform_1, window_bounds = array<i64: 1, 4, 16>}, {pipeline_mode = #tpu.pipeline_mode<synchronous>, transform_indices = @transform_2, window_bounds = array<i64: 4, 12>}, {pipeline_mode = #tpu.pipeline_mode<synchronous>, transform_indices = @transform_3, window_bounds = array<i64: 4, 1>}, {pipeline_mode = #tpu.pipeline_mode<synchronous>, transform_indices = @transform_4, window_bounds = array<i64: 4, 4>}, {pipeline_mode = #tpu.pipeline_mode<synchronous>, transform_indices = @transform_5, window_bounds = array<i64: 4, 1>}, {transform_indices = @transform_6, window_bounds = array<i64: 1, 4, 16>}]} {
    %c0 = arith.constant 0 : index
    %c0_0 = arith.constant 0 : index
    %c0_1 = arith.constant 0 : index
    %0 = vector.load %arg2[%c0, %c0_0, %c0_1] : memref<1x4x16xf32, #tpu.memory_space<vmem>>, vector<1x4x16xf32>
    %1 = vector.shape_cast %0 : vector<1x4x16xf32> to vector<4x16xf32>
    %c0_i32 = arith.constant 0 : i32
    %2 = arith.cmpi sgt, %arg1, %c0_i32 : i32
    %c0_2 = arith.constant 0 : index
    %c0_3 = arith.constant 0 : index
    %3 = vector.load %arg9[%c0_2, %c0_3] : memref<4x2xf32, #tpu.memory_space<vmem>>, vector<4x2xf32>
    %cst = arith.constant 0.000000e+00 : f32
    %4 = vector.broadcast %cst : f32 to vector<4x2xf32>
    %5 = arith.select %2, %3, %4 : vector<4x2xf32>
    %6 = tpu.iota {dimensions = array<i32: 1>} : vector<1x2xi32>
    %c1_i32 = arith.constant 1 : i32
    %7 = arith.addi %arg1, %c1_i32 : i32
    %c16_i32 = arith.constant 16 : i32
    %8 = arith.muli %7, %c16_i32 : i32
    %c16_i32_4 = arith.constant 16 : i32
    %9 = arith.subi %c16_i32_4, %8 : i32
    %10 = vector.broadcast %9 : i32 to vector<1x2xi32>
    %11 = arith.cmpi slt, %6, %10 : vector<1x2xi32>
    %c0_5 = arith.constant 0 : index
    %c0_6 = arith.constant 0 : index
    %c0_7 = arith.constant 0 : index
    %12 = vector.load %arg3[%c0_5, %c0_6, %c0_7] : memref<1x4x16xf32, #tpu.memory_space<vmem>>, vector<1x4x2xf32>
    %13 = vector.shape_cast %12 : vector<1x4x2xf32> to vector<4x2xf32>
    %cst_8 = arith.constant 0.000000e+00 : f32
    %14 = vector.shape_cast %11 : vector<1x2xi1> to vector<1x2xi1>
    %15 = vector.broadcast %14 : vector<1x2xi1> to vector<4x2xi1>
    %16 = vector.broadcast %cst_8 : f32 to vector<4x2xf32>
    %17 = arith.select %15, %13, %16 : vector<4x2xi1>, vector<4x2xf32>
    %18 = vector.extract_strided_slice %1 {offsets = [0, 14], sizes = [4, 2], strides = [1, 1]} : vector<4x16xf32> to vector<4x2xf32>
    %c0_9 = arith.constant 0 : index
    %c0_10 = arith.constant 0 : index
    %19 = vector.load %arg9[%c0_9, %c0_10] : memref<4x2xf32, #tpu.memory_space<vmem>>, vector<4x2xf32>
    tpu.vector_store %arg9[%c0_9, %c0_10], %18 {strides = array<i32>} : memref<4x2xf32, #tpu.memory_space<vmem>>, vector<4x2xf32>,
    %20 = vector.extract_strided_slice %1 {offsets = [0, 0], sizes = [4, 14], strides = [1, 1]} : vector<4x16xf32> to vector<4x14xf32>
    %21 = tpu.concatenate %5, %20 in 1 : vector<4x2xf32>, vector<4x14xf32> -> vector<4x16xf32>
    %22 = vector.extract_strided_slice %1 {offsets = [0, 2], sizes = [4, 14], strides = [1, 1]} : vector<4x16xf32> to vector<4x14xf32>
    %23 = tpu.concatenate %22, %17 in 1 : vector<4x14xf32>, vector<4x2xf32> -> vector<4x16xf32>
    %24 = tpu.concatenate %21, %1, %23 in 0 : vector<4x16xf32>, vector<4x16xf32>, vector<4x16xf32> -> vector<12x16xf32>
    %c0_11 = arith.constant 0 : index
    %c0_12 = arith.constant 0 : index
    %25 = vector.load %arg4[%c0_11, %c0_12] : memref<4x12xf32, #tpu.memory_space<vmem>>, vector<4x12xf32>
    %cst_13 = arith.constant dense<0.000000e+00> : vector<4x16xf32>
    %26 = tpu.matmul %25, %24, %cst_13 {dimension_numbers = #tpu.dot_dimension_numbers<[1], [0], [0], [1], [0, 0, 1, 1], [], []>} : vector<4x12xf32>, vector<12x16xf32>, vector<4x16xf32> -> vector<4x16xf32>
    %c0_14 = arith.constant 0 : index
    %c0_15 = arith.constant 0 : index
    %27 = vector.load %arg5[%c0_14, %c0_15] : memref<4x1xf32, #tpu.memory_space<vmem>>, vector<4x1xf32>
    %28 = vector.broadcast %27 : vector<4x1xf32> to vector<4x16xf32>
    %29 = arith.addf %26, %28 : vector<4x16xf32>
    %cst_16 = arith.constant 0.000000e+00 : f32
    %30 = vector.broadcast %cst_16 : f32 to vector<4x16xf32>
    %31 = arith.maximumf %29, %30 : vector<4x16xf32>
    %c0_17 = arith.constant 0 : index
    %c0_18 = arith.constant 0 : index
    %32 = vector.load %arg6[%c0_17, %c0_18] : memref<4x4xf32, #tpu.memory_space<vmem>>, vector<4x4xf32>
    %cst_19 = arith.constant dense<0.000000e+00> : vector<4x16xf32>
    %33 = tpu.matmul %32, %31, %cst_19 {dimension_numbers = #tpu.dot_dimension_numbers<[1], [0], [0], [1], [0, 0, 1, 1], [], []>} : vector<4x4xf32>, vector<4x16xf32>, vector<4x16xf32> -> vector<4x16xf32>
    %c0_20 = arith.constant 0 : index
    %c0_21 = arith.constant 0 : index
    %34 = vector.load %arg7[%c0_20, %c0_21] : memref<4x1xf32, #tpu.memory_space<vmem>>, vector<4x1xf32>
    %35 = vector.broadcast %34 : vector<4x1xf32> to vector<4x16xf32>
    %36 = arith.addf %33, %35 : vector<4x16xf32>
    %37 = arith.addf %1, %36 : vector<4x16xf32>
    %c0_22 = arith.constant 0 : index
    %c0_23 = arith.constant 0 : index
    %c0_24 = arith.constant 0 : index
    %38 = vector.load %arg8[%c0_22, %c0_23, %c0_24] : memref<1x4x16xf32, #tpu.memory_space<vmem>>, vector<1x4x16xf32>
    %39 = vector.shape_cast %38 : vector<1x4x16xf32> to vector<4x16xf32>
    %40 = vector.shape_cast %37 : vector<4x16xf32> to vector<1x4x16xf32>
    tpu.vector_store %arg8[%c0_22, %c0_23, %c0_24], %40 {strides = array<i32>} : memref<1x4x16xf32, #tpu.memory_space<vmem>>, vector<1x4x16xf32>,
    return
  }
  func.func @transform_0(%arg0: i32, %arg1: i32) -> (i32, i32, i32) {
    %c0_i32 = arith.constant 0 : i32
    %c0_i32_0 = arith.constant 0 : i32
    return %arg0, %c0_i32, %arg1 : i32, i32, i32
  }
  func.func @transform_1(%arg0: i32, %arg1: i32) -> (i32, i32, i32) {
    %c1_i32 = arith.constant 1 : i32
    %0 = arith.addi %arg1, %c1_i32 : i32
    %c1_i32_0 = arith.constant 1 : i32
    %1 = arith.muli %0, %c1_i32_0 : i32
    %c0_i32 = arith.constant 0 : i32
    %2 = arith.minsi %1, %c0_i32 : i32
    %c0_i32_1 = arith.constant 0 : i32
    %c0_i32_2 = arith.constant 0 : i32
    return %arg0, %c0_i32_1, %2 : i32, i32, i32
  }
  func.func @transform_2(%arg0: i32, %arg1: i32) -> (i32, i32) {
    %c0_i32 = arith.constant 0 : i32
    %c0_i32_0 = arith.constant 0 : i32
    %c0_i32_1 = arith.constant 0 : i32
    return %c0_i32, %c0_i32_0 : i32, i32
  }
  func.func @transform_3(%arg0: i32, %arg1: i32) -> (i32, i32) {
    %c0_i32 = arith.constant 0 : i32
    %c0_i32_0 = arith.constant 0 : i32
    %c0_i32_1 = arith.constant 0 : i32
    return %c0_i32, %c0_i32_0 : i32, i32
  }
  func.func @transform_4(%arg0: i32, %arg1: i32) -> (i32, i32) {
    %c0_i32 = arith.constant 0 : i32
    %c0_i32_0 = arith.constant 0 : i32
    %c0_i32_1 = arith.constant 0 : i32
    return %c0_i32, %c0_i32_0 : i32, i32
  }
  func.func @transform_5(%arg0: i32, %arg1: i32) -> (i32, i32) {
    %c0_i32 = arith.constant 0 : i32
    %c0_i32_0 = arith.constant 0 : i32
    %c0_i32_1 = arith.constant 0 : i32
    return %c0_i32, %c0_i32_0 : i32, i32
  }
  func.func @transform_6(%arg0: i32, %arg1: i32) -> (i32, i32, i32) {
    %c0_i32 = arith.constant 0 : i32
    %c0_i32_0 = arith.constant 0 : i32
    return %arg0, %c0_i32, %arg1 : i32, i32, i32
  }
}

</mosaic_0001>

<bundles_post_ra>
// kernel: tpu_custom_call.1
= control target key start
LH: loop header
LB: loop body
LE: loop exit
PB: predicated region body
PF: predicated region fallthrough
CT: control target
= control target key end

     0   :  { %11 = vsyncpa [#allocation4], 0  ;;  %s1112_s0 = inlined_call_operand.vmem [shape: f32[2,4,16], index: 0, kind: input, shape index: {}]   ;;  %s1113_s1 = inlined_call_operand.hbm [shape: f32[2,4,16], index: 1, kind: input, shape index: {}]   ;;  %s1114_s2 = inlined_call_operand.vmem [shape: f32[4,12], index: 2, kind: input, shape index: {}]   ;;  %s1115_s3 = inlined_call_operand.vmem [shape: f32[4,1], index: 3, kind: input, shape index: {}]   ;;  %s1116_s4 = inlined_call_operand.vmem [shape: f32[4,4], index: 4, kind: input, shape index: {}]   ;;  %s1117_s5 = inlined_call_operand.vmem [shape: f32[4,1], index: 5, kind: input, shape index: {}]   ;;  %s1118_s6 = inlined_call_operand.hbm [shape: f32[2,4,16], index: 6, kind: output, shape index: {}]  }
   0x1   :  { %13 = vsyncpa [#allocation4 + $0x1], 0 }
   0x2   :  { %14 = vsyncpa [#allocation5], 0 }
   0x3   :  { %16 = vsyncpa [#allocation5 + $0x1], 0  ;;  %s920_s21 = smov 0   ;;  %s922_s22 = smov 0  }
   0x4   :  { %s924_s23 = smov 0   ;;  %s926_s24 = smov 0  }
   0x5   :  { %s928_s25 = smov 0   ;;  %s930_s26 = smov 0  }
   0x6 LB: > { %s648_s27 = sadd.s32 4294967295, %s872_s26   ;;  %s649_s28 = sadd.s32 4294967294, %s872_s26   ;;  %s872_s26 = sphi %s930_s26, %s22_s26   ;;  %s868_s25 = sphi %s928_s25, %s1134_s25   ;;  %s864_s24 = sphi %s926_s24, %s1133_s24   ;;  %s860_s23 = sphi %s924_s23, %s1132_s23   ;;  %s856_s22 = sphi %s922_s22, %s1131_s22   ;;  %s852_s21 = sphi %s920_s21, %s1130_s21  }
   0x7   : > { %s34_s29 = sadd.s32 1, %s868_s25  ;;  %s77_s30 = sadd.s32 1, %s860_s23 }
   0x8   : > { %p36_p0 = scmp.ge.s32.totalorder %s34_s29, 2  ;;  %p84_p1 = scmp.ne.s32.totalorder %s860_s23, %s856_s22 }
   0x9   : > { %p85_p2 = scmp.eq.s32.totalorder %s872_s26, 0  ;;  %p90_p3 = scmp.ne.s32.totalorder %s856_s22, %s852_s21 }
   0xa   : > { %s1136_s29 = smov (%p36_p0, %s34_s29), 0  ;;  %p91_p5 = scmp.eq.s32.totalorder %s648_s27, 0 }
   0xb   : > { %p961_p4 = por %p85_p2, %p84_p1  ;;  %s72_s8 = ssub.s32 %s868_s25, %s1136_s29 }
   0xc   : > { %p200_p6 = scmp.eq.s32.totalorder %s648_s27, 1  ;;  %p75_p7 = scmp.eq.s32.totalorder %s72_s8, 0 }
   0xd   : > { %p967_p8 = por %p91_p5, %p90_p3  ;;  %p206_p10 = scmp.eq.s32.totalorder %s649_s28, 1 }
   0xe   : > { %p971_p9 = por %p200_p6, %p84_p1  ;;  %p699_p13 = scmp.lt.s32.totalorder %s872_s26, 2 }
   0xf   : > { %s976_s11 = scalar_select %p75_p7, %s860_s23, %s77_s30  }
  0x10   : > { %s1122_s10 = scalar_select %p971_p9, 1, 0 }
  0x11   : > { %p978_p11 = por %p206_p10, %p90_p3  ;;  %s248_s13 = sand.u32 1, %s860_s23  }
  0x12   : > { %s652_s14 = sshll.u32 %s248_s13, 2  ;;  %s653_s15 = sshll.u32 %s868_s25, 6 }
  0x13   : > { %s1123_s12 = scalar_select %p978_p11, 1, 0 }
  0x14   : > { %s989_s18 = scalar_lea.hbm %s1113_s1, %s653_s15  ;;  %s252_s19 = scalar_lea.vmem [#allocation3], %s652_s14 }
  0x15   : > { %s263_s20 = sshll.u32 %s252_s19, 4  ;;  %p995_p0 = pnand %p699_p13, %p961_p4  ;;  %s991_s20 = int_to_ptr.vmem [resolvable:$true] %s263_s20 }
  0x16   : > { %s249_s28 = scalar_lea.sflag [#allocation4], %s248_s13  ;;  %s760_s30 = scalar_lea.hbm %s989_s18, 64 }
  0x17   : > { %p761_p3 = scmp.ne.s32.totalorder %s989_s18, %s760_s30  ;;  %p762_p5 = pneg %p995_p0 }
  0x18   : > { %s765_s7 = scalar_lea.hbm %s1113_s1, 128  ;;  %p766_p4 = scmp.lt.u32.totalorder %s989_s18, %s1113_s1 }
  0x19   : > { %p763_p6 = pnand %p762_p5, %p761_p3  ;;  %p767_p10 = scmp.lt.u32.totalorder %s765_s7, %s760_s30 }
  0x1a   : > { %p769_p12 = scmp.lt.u32.totalorder %s760_s30, %s989_s18 }
  0x1b   : > { %p764_p7 = pneg %p763_p6  ;;  %p768_p13 = por %p767_p10, %p766_p4 }
  0x1d   : > { %p770_p1 = por %p769_p12, %p768_p13 }
  0x1f   : > { %p771_p2 = pnand %p770_p1, %p764_p7 }
  0x21   : > { %774 = shalt.err (!%p771_p2)
}
  0x22   : > { %s775_s13 = scalar_lea.vmem %s991_s20, 64  ;;  %s874_s17 = smov [#allocation3]  }
  0x23   : > { %p776_p3 = scmp.ne.s32.totalorder %s991_s20, %s775_s13  ;;  %s780_s19 = sshll.u32 %s874_s17, 4  ;;  %s781_s19 = int_to_ptr.vmem [resolvable:$false] %s780_s19 }
  0x24   : > { %s782_s8 = scalar_lea.vmem %s781_s19, 128  ;;  %p783_p9 = scmp.lt.s32.totalorder %s991_s20, %s781_s19 }
  0x25   : > { %p778_p6 = pnand %p776_p3, %p762_p5  ;;  %p784_p4 = scmp.lt.s32.totalorder %s782_s8, %s775_s13 }
  0x27   : > { %p779_p11 = pneg %p778_p6  ;;  %p785_p10 = por %p784_p4, %p783_p9 }
  0x29   : > { %p786_p12 = pnand %p785_p10, %p779_p11 }
  0x2b   : > { %789 = shalt.err (!%p786_p12)
}
  0x2c   : > { %694 = dma.hbm_to_vmem [thread:$0]  (!%p995_p0), %s989_s18, 64, %s991_s20, %s249_s28  }
  0x2d   : > { %p1125_p1 = scmp.lt.s32.totalorder %s872_s26, 3  ;;  %p1126_p2 = scmp.ge.s32.totalorder %s872_s26, 1 }
  0x2f   : > { %p269_p5 = pnand %p1126_p2, %p1125_p1 }
  0x30   : > { %s1031_s30 = sand.u32 (!%p269_p5), 1, %s856_s22  }
  0x31   : > { %272 = sbr.rel (%p269_p5) target bundleno = 636 (0x27c), region = 44  ;;  %s275_s14 = scalar_lea.sflag (!%p269_p5), [#allocation4], %s1031_s30 }
  0x38   : > { %843 = dma.done.wait (%p967_p8), %s275_s14, 64  }
  0x39   : > { %845 = vsyncadd (%p967_p8), %s275_s14, 4294967232  ;;  %p314_p9 = scmp.lt.s32.totalorder %s864_s24, 1  ;;  %v875_v0 = vmov 0.0   ;;  %s876_s20 = smov 14   ;;  %v877_v1 = vmov 0.0|0.0   ;;  %vm878_vm0 = vmmov 0  }
  0x3a   : > { %678 = vmatprep.subr.mxu1 %v875_v0  ;;  %357 = vrot.lane.b32.xlu1 %v875_v0, %s876_s20  ;;  %v879_v2 = vmov 0   ;;  %v367_v4 = vld [vmem:[%s1115_s3] sm:$0xf]  ;;  %s880_s13 = smov 2   ;;  %s881_s17 = smov 126   ;;  %vm351_vm1 = vcmask 15360  }
  0x3b   : > { %s315_s18 = scalar_select %p314_p9, %s864_s24, 1  ;;  %683 = vmatprep.subr.bf16.mxu0 %v877_v1  ;;  %675 = vmatprep.mubr.msk.f32.mxu0 %vm878_vm0, %v875_v0  ;;  %vm364_vm2 = vcmask 1043456   ;;  %vm360_vm3 = vcmask 113664   ;;  %vm882_vm4 = vmmov 1   ;;  %v366_v13 = vld [vmem:[%s1114_s2] sm:$0xf] }
  0x3c   : > { %680 = vmatprep.mubr.msk.f32.mxu1 %vm878_vm0, %v875_v0  ;;  %758 = vset.pattern.permute.xlu1 %v879_v2  ;;  %vm685_vm5 = vmpackc.low %vm364_vm2, %vm882_vm4  ;;  %vm373_vm6 = vcmask 97280   ;;  %v452_v14 = vld [vmem:[%s1117_s5] sm:$0xf]  ;;  %s883_s20 = smov 114   ;;  %vm458_vm7 = vcmask 31744   ;;  %s656_s7 = sshll.u32 %s1031_s30, 2 }
  0x3d   : > { %s657_s27 = sshll.u32 %s315_s18, 2  ;;  %759 = vset.pattern.permute.xlu0 %v879_v2  ;;  %v451_v20 = vld [vmem:[%s1116_s4] sm:$0xf]  ;;  %s313_s9 = scalar_lea.vmem [#allocation6], %s656_s7  ;;  %vm536_vm8 = vcmask 125952  }
  0x3e   : > { %s320_s15 = scalar_lea.vmem %s1112_s0, %s657_s27  ;;  %370 = vperm.xlu1 %758, %v367_v4   ;;  %s553_s16 = sshll.u32 %s313_s9, 4  ;;  %s1065_s16 = int_to_ptr.vmem [resolvable:$true] %s553_s16 }
  0x3f   : > { %v324_v3 = vld [vmem:[%s320_s15] sm:$0xf]  ;;  %s663_s15 = sshll.u32 %s864_s24, 6  ;;  %s539_s8 = scalar_lea.sflag [#allocation5], %s1031_s30 }
  0x40   : > { %348 = vrot.lane.b32.xlu0 %v324_v3, %s880_s13  ;;  %v362_v6 = vrot.slane %v324_v3, 4  ;;  %s1063_s19 = scalar_lea.hbm %s1118_s6, %s663_s15  ;;  %s790_s14 = scalar_lea.vmem %s1065_s16, 64 }
  0x41   : > { %p791_p8 = scmp.ne.s32.totalorder %s1065_s16, %s790_s14  ;;  %p1127_p11 = scmp.ne.s32.totalorder %s1122_s10, 0 }
  0x42   : > { %343 = vrot.lane.b32.xlu1 %v324_v3, %s883_s20  ;;  %s884_s24 = smov [#allocation6]  }
  0x43   : > { %p792_p0 = pnand %p791_p8, %p1127_p11  ;;  %s794_s18 = sshll.u32 %s884_s24, 4  ;;  %s795_s18 = int_to_ptr.vmem [resolvable:$false] %s794_s18 }
  0x44   : > { %353 = vrot.lane.b32.xlu0 %v324_v3, %s881_s17  ;;  %s796_s20 = scalar_lea.vmem %s795_s18, 128  ;;  %p797_p13 = scmp.lt.s32.totalorder %s1065_s16, %s795_s18 }
  0x45   : > { %p793_p7 = pneg %p792_p0  ;;  %p798_p3 = scmp.lt.s32.totalorder %s796_s20, %s790_s14 }
  0x47   : > { %p799_p6 = por %p798_p3, %p797_p13 }
  0x48   : > { %455 = vperm.xlu0 %759, %v452_v14  }
  0x49   : > { %p800_p4 = pnand %p799_p6, %p793_p7 }
  0xac   : > { %v358_v8 = vpop.permute.xlu1 %357 }
  0xb2   : > { %v349_v5 = vpop.permute.xlu0 %348 }
  0xb3   : > { %v352_v7 = vsel %vm351_vm1, 0.0, %v349_v5 }
  0xb4   : > { %v365_v10 = vsel %vm364_vm2, %v352_v7, %v362_v6 }
  0xb6   : > { %v354_v9 = vpop.permute.xlu0 %353 }
  0xb7   : > { %v361_v11 = vsel %vm360_vm3, %v354_v9, %v358_v8 }
  0xb8   : > { %v684_v12 = vpack.c.bf16 %v361_v11, %v365_v10 }
  0xba   : > { %686 = vmatpush3.bf16.msk.msra.mxu0 %vm685_vm5, %v684_v12 }
  0xbd   : > { %676 = vmatmul.mubr.msk.f32.vlgmr.msra.gmra.mrb[0].mxu0 %vm373_vm6, %v366_v13  ;;  %v371_v15 = vpop.permute.xlu1 %370 }
  0xc1   : > { %v344_v21 = vpop.permute.xlu1 %343 }
  0xc7   : > { %v456_v22 = vpop.permute.xlu0 %455 }
 0x190   : > { %v446_v16 = vpop.f32.mrb[0].mxu0 }
 0x191   : > { %v447_v17 = vadd.f32 %v446_v16, %v371_v15  ;;  %v677_v18 = vpop.f32.mrb[1].mxu0 }
 0x193   : > { %v450_v19 = vmax.f32 %v447_v17, 0.0 }
 0x195   : > { %679 = vmatpush3.msk.msra.mxu1 %vm364_vm2, %v450_v19 }
 0x196   : > { %681 = vmatmul.mubr.msk.f32.vlgmr.msra.gmra.mrb[0].mxu1 %vm458_vm7, %v451_v20 }
 0x269   : > { %v531_v23 = vpop.f32.mrb[0].mxu1 }
 0x26a   : > { %v532_v24 = vadd.f32 %v531_v23, %v456_v22  ;;  %v682_v25 = vpop.f32.mrb[1].mxu1 }
 0x26c   : > { %v535_v26 = vadd.f32 %v532_v24, %v324_v3 }
 0x26e   : > { %537 = vst.msk [vmem:[%s313_s9] sm:$0xf] %vm536_vm8, %v535_v26 }
 0x26f   : > { %803 = shalt.err (!%p800_p4)
}
 0x270   : > { %s804_s30 = scalar_lea.hbm %s1063_s19, 64  ;;  %s808_s7 = scalar_lea.hbm %s1118_s6, 128 }
 0x271   : > { %p805_p10 = scmp.ne.s32.totalorder %s1063_s19, %s804_s30  ;;  %p809_p2 = scmp.lt.u32.totalorder %s1063_s19, %s1118_s6 }
 0x272   : > { %p810_p5 = scmp.lt.u32.totalorder %s808_s7, %s804_s30  ;;  %p812_p8 = scmp.lt.u32.totalorder %s804_s30, %s1063_s19 }
 0x273   : > { %p806_p12 = pnand %p805_p10, %p1127_p11 }
 0x274   : > { %p811_p9 = por %p810_p5, %p809_p2 }
 0x275   : > { %p807_p1 = pneg %p806_p12 }
 0x276   : > { %p813_p0 = por %p812_p8, %p811_p9 }
 0x278   : > { %p814_p7 = pnand %p813_p0, %p807_p1 }
 0x27a   : > { %817 = shalt.err (!%p814_p7)
}
 0x27b   : > { %689 = dma.vmem_to_hbm [thread:$0]  (%p1127_p11), %s1065_s16, 64, %s1063_s19, %s539_s8  }
 0x27c PF: > { %s565_s13 = sand.u32 1, %s852_s21   ;;  %p1128_p13 = scmp.ne.s32.totalorder %s1123_s12, 0 }
 0x27d   : > { %p1129_p3 = scmp.ge.s32.totalorder %s872_s26, 2  ;;  %s566_s17 = scalar_lea.sflag [#allocation5], %s565_s13 }
 0x27f   : > { %p696_p6 = pnand %p1129_p3, %p1128_p13 }
 0x281   : > { %847 = dma.done.wait (!%p696_p6), %s566_s17, 64  }
 0x282   : > { %849 = vsyncadd (!%p696_p6), %s566_s17, 4294967232  ;;  %s22_s26 = sadd.s32 1, %s872_s26   ;;  %s1130_s21 = smov %s856_s22 }
 0x283   : > { %p19_p4 = scmp.ge.s32.totalorder %s22_s26, 4   ;;  %s1131_s22 = smov %s860_s23 }
 0x284   : > { %s1132_s23 = smov %s976_s11  ;;  %s1133_s24 = smov %s868_s25 }
 0x285   : > { %s1134_s25 = smov %s1136_s29  ;;  %21 = sbr.rel (!%p19_p4) target bundleno = 6 (0x6), region = 92 }
 0x28c   :  { %571 = vsyncpa [#allocation4], 1 }
 0x28d   :  { %573 = vsyncpa [#allocation4 + $0x1], 1 }
 0x28e   :  { %574 = vsyncpa [#allocation5], 1 }
 0x28f   :  { %576 = vsyncpa [#allocation5 + $0x1], 1 }

</bundles_post_ra>
